<compile_context>
chip_gen: v5e
topology: v5e:2x2
jax: 0.10.0
libtpu: 0.0.40
codegen_flags: <defaults>
</compile_context>

<pallas_src>
import functools

import jax
import jax.numpy as jnp
from jax.experimental import pallas as pl
from jax.experimental.pallas import tpu as pltpu

HIDDEN = 64


def _round_up(n, m):
    return ((n + m - 1) // m) * m


def _cdiv(a, b):
    return -(-a // b)


def _mlp_kernel(x_ref, w1_ref, b1_ref, w2_ref, b2_ref, w3_ref, b3_ref, o_ref):
    # Fused 3-layer MLP on one batch tile. Matmuls hit the MXU with f32
    # accumulation; bias add + ReLU are VPU ops on the f32 accumulators, so a
    # bf16 compute dtype never needs bf16 VPU/EUP support (fine on v5e).
    x = x_ref[...]
    h = jnp.dot(x, w1_ref[...], preferred_element_type=jnp.float32) + b1_ref[...]
    h = jnp.maximum(h, 0.0).astype(w2_ref.dtype)
    h = jnp.dot(h, w2_ref[...], preferred_element_type=jnp.float32) + b2_ref[...]
    h = jnp.maximum(h, 0.0).astype(w3_ref.dtype)
    out = jnp.dot(h, w3_ref[...], preferred_element_type=jnp.float32) + b3_ref[...]
    o_ref[...] = out.astype(o_ref.dtype)


def _choose_tile(B, block_b):
    """Pick batch tile bb (multiple of 8) and grid step count.

    When more than one step is needed, prefer an even step count so v7x's two
    TensorCores get balanced work; the slightly smaller tile this implies is
    negligible on single-TC chips.
    """
    bb = _round_up(min(block_b, B), 8)
    steps = _cdiv(B, bb)
    if steps > 1 and steps % 2 == 1:
        bb_even = _round_up(_cdiv(B, steps + 1), 8)
        if _cdiv(B, bb_even) % 2 == 0:
            bb = bb_even
            steps = _cdiv(B, bb)
    return bb, steps


@functools.partial(jax.jit, static_argnames=("block_b", "compute_dtype"))
def meta_controller_forward(x, params, block_b=1024, compute_dtype=jnp.float32):
    """Forward pass of MetaController (Pallas path).

    x: [B, input_dim] float32
    params: dict with w1 [in,64], b1 [64], w2 [64,64], b2 [64], w3 [64,out], b3 [out]
    compute_dtype: dtype for x / weight matmuls (f32 or bf16); accumulation,
        bias add, ReLU and the output stay f32.
    returns: [B, output_dim] float32
    """
    B, input_dim = x.shape
    output_dim = params["w3"].shape[1]

    bb, steps = _choose_tile(B, block_b)
    # NOTE: with block_b <= 2048 the double-buffered tiles are well under every
    # generation's scoped-VMEM default (16 MiB on v5e); no vmem_limit_bytes needed.

    cd = jnp.dtype(compute_dtype)
    x_c = x.astype(cd)
    w1 = params["w1"].astype(cd)
    w2 = params["w2"].astype(cd)
    w3 = params["w3"].astype(cd)

    # Biases as (1, N) f32 rows so they broadcast over the batch tile in-kernel
    # and are added to the f32 accumulators.
    b1 = params["b1"].reshape(1, -1).astype(jnp.float32)
    b2 = params["b2"].reshape(1, -1).astype(jnp.float32)
    b3 = params["b3"].reshape(1, -1).astype(jnp.float32)

    w_bytes = (w1.size + w2.size + w3.size) * cd.itemsize + (b1.size + b2.size + b3.size) * 4
    cost = pl.CostEstimate(
        flops=2 * B * (input_dim * HIDDEN + HIDDEN * HIDDEN + HIDDEN * output_dim),
        transcendentals=0,
        bytes_accessed=B * input_dim * cd.itemsize + B * output_dim * 4 + w_bytes,
    )

    out = pl.pallas_call(
        _mlp_kernel,
        out_shape=jax.ShapeDtypeStruct((B, output_dim), jnp.float32),
        grid_spec=pl.GridSpec(
            grid=(steps,),
            in_specs=[
                # batch tile of activations (ragged last block masked by Pallas)
                pl.BlockSpec((bb, input_dim), lambda i: (i, 0)),
                # weights / biases: full arrays, same block every grid step
                pl.BlockSpec((input_dim, HIDDEN), lambda i: (0, 0)),
                pl.BlockSpec((1, HIDDEN), lambda i: (0, 0)),
                pl.BlockSpec((HIDDEN, HIDDEN), lambda i: (0, 0)),
                pl.BlockSpec((1, HIDDEN), lambda i: (0, 0)),
                pl.BlockSpec((HIDDEN, output_dim), lambda i: (0, 0)),
                pl.BlockSpec((1, output_dim), lambda i: (0, 0)),
            ],
            out_specs=pl.BlockSpec((bb, output_dim), lambda i: (i, 0)),
        ),
        compiler_params=pltpu.CompilerParams(
            dimension_semantics=("parallel",),
        ),
        cost_estimate=cost,
    )(x_c, w1, b1, w2, b2, w3, b3)

    return out


def _reference(x, p):
    h = jnp.maximum(x @ p["w1"] + p["b1"], 0.0)
    h = jnp.maximum(h @ p["w2"] + p["b2"], 0.0)
    return h @ p["w3"] + p["b3"]


def meta_controller_apply(x, params, *, min_pallas_batch=64, **kwargs):
    """Dispatcher: route tiny batches through plain XLA (fixed pallas_call cost
    dwarfs this MLP's FLOPs for B < ~64); larger batches use the fused kernel."""
    if x.shape[0] < min_pallas_batch:
        return _reference(x, params)
    return meta_controller_forward(x, params, **kwargs)


def init_params(key, input_dim, output_dim):
    """Deterministic synthetic init (uniform, like PyTorch Linear default bounds)."""
    ks = jax.random.split(key, 6)

    def _lin(kw, kb, fan_in, fan_out):
        bound = 1.0 / jnp.sqrt(jnp.float32(fan_in))
        w = jax.random.uniform(kw, (fan_in, fan_out), jnp.float32, -bound, bound)
        b = jax.random.uniform(kb, (fan_out,), jnp.float32, -bound, bound)
        return w, b

    w1, b1 = _lin(ks[0], ks[1], input_dim, HIDDEN)
    w2, b2 = _lin(ks[2], ks[3], HIDDEN, HIDDEN)
    w3, b3 = _lin(ks[4], ks[5], HIDDEN, output_dim)
    return {"w1": w1, "b1": b1, "w2": w2, "b2": b2, "w3": w3, "b3": b3}


if __name__ == "__main__":
    key = jax.random.PRNGKey(0)
    k_x, k_p, k_x2 = jax.random.split(key, 3)

    input_dim = 32   # state observation dim
    output_dim = 8   # number of sampling-range choices
    params = init_params(k_p, input_dim, output_dim)

    # Small batch: single ragged tile, grid=(1,).
    x_small = jax.random.normal(k_x, (2, input_dim), jnp.float32)
    out_small = jax.block_until_ready(meta_controller_forward(x_small, params))
    ref_small = _reference(x_small, params)
    assert out_small.shape == (2, output_dim)
    assert jnp.allclose(out_small, ref_small, atol=1e-5, rtol=1e-5), "small-batch mismatch"

    # Larger batch with default tiling (block_b=1024 -> one big tile here).
    x_big = jax.random.normal(k_x2, (600, input_dim), jnp.float32)
    out_big = jax.block_until_ready(meta_controller_forward(x_big, params))
    ref_big = _reference(x_big, params)
    assert out_big.shape == (600, output_dim)
    assert jnp.allclose(out_big, ref_big, atol=1e-4, rtol=1e-4), "large-batch mismatch"

    # Multi-step grid: even step count (v7x balance) + ragged last block.
    out_multi = jax.block_until_ready(meta_controller_forward(x_big, params, block_b=256))
    assert out_multi.shape == (600, output_dim)
    assert jnp.allclose(out_multi, ref_big, atol=1e-4, rtol=1e-4), "multi-step mismatch"

    # bf16 compute path (f32 accumulation / bias / ReLU / output), loose tolerance.
    out_bf16 = jax.block_until_ready(
        meta_controller_forward(x_big, params, compute_dtype=jnp.bfloat16))
    assert out_bf16.shape == (600, output_dim)
    assert jnp.allclose(out_bf16, ref_big, atol=1e-1, rtol=1e-1), "bf16-path mismatch"

    # Dispatcher: tiny batch routes through plain XLA.
    out_route = jax.block_until_ready(meta_controller_apply(x_small, params))
    assert jnp.allclose(out_route, ref_small, atol=1e-5, rtol=1e-5), "dispatcher mismatch"

    print("KERNEL_OK")
</pallas_src>

<mosaic_0001>
module attributes {stable_mosaic.version = 11 : i64} {
  func.func @_mlp_kernel(%arg0: i32, %arg1: memref<8x32xf32, #tpu.memory_space<vmem>>, %arg2: memref<32x64xf32, #tpu.memory_space<vmem>>, %arg3: memref<1x64xf32, #tpu.memory_space<vmem>>, %arg4: memref<64x64xf32, #tpu.memory_space<vmem>>, %arg5: memref<1x64xf32, #tpu.memory_space<vmem>>, %arg6: memref<64x8xf32, #tpu.memory_space<vmem>>, %arg7: memref<1x8xf32, #tpu.memory_space<vmem>>, %arg8: memref<8x8xf32, #tpu.memory_space<vmem>>) attributes {dimension_semantics = [#tpu.dimension_semantics<parallel>], iteration_bounds = array<i64: 1>, scalar_prefetch = 0 : i64, scratch_operands = 0 : i64, tpu.core_type = #tpu.core_type<tc>, window_params = [{transform_indices = @transform_0, window_bounds = array<i64: 8, 32>}, {pipeline_mode = #tpu.pipeline_mode<synchronous>, transform_indices = @transform_1, window_bounds = array<i64: 32, 64>}, {pipeline_mode = #tpu.pipeline_mode<synchronous>, transform_indices = @transform_2, window_bounds = array<i64: 1, 64>}, {pipeline_mode = #tpu.pipeline_mode<synchronous>, transform_indices = @transform_3, window_bounds = array<i64: 64, 64>}, {pipeline_mode = #tpu.pipeline_mode<synchronous>, transform_indices = @transform_4, window_bounds = array<i64: 1, 64>}, {pipeline_mode = #tpu.pipeline_mode<synchronous>, transform_indices = @transform_5, window_bounds = array<i64: 64, 8>}, {pipeline_mode = #tpu.pipeline_mode<synchronous>, transform_indices = @transform_6, window_bounds = array<i64: 1, 8>}, {transform_indices = @transform_7, window_bounds = array<i64: 8, 8>}]} {
    %c0 = arith.constant 0 : index
    %c0_0 = arith.constant 0 : index
    %0 = vector.load %arg1[%c0, %c0_0] : memref<8x32xf32, #tpu.memory_space<vmem>>, vector<8x32xf32>
    %c0_1 = arith.constant 0 : index
    %c0_2 = arith.constant 0 : index
    %1 = vector.load %arg2[%c0_1, %c0_2] : memref<32x64xf32, #tpu.memory_space<vmem>>, vector<32x64xf32>
    %cst = arith.constant dense<0.000000e+00> : vector<8x64xf32>
    %2 = tpu.matmul %0, %1, %cst {dimension_numbers = #tpu.dot_dimension_numbers<[1], [0], [0], [1], [0, 0, 1, 1], [], []>} : vector<8x32xf32>, vector<32x64xf32>, vector<8x64xf32> -> vector<8x64xf32>
    %c0_3 = arith.constant 0 : index
    %c0_4 = arith.constant 0 : index
    %3 = vector.load %arg3[%c0_3, %c0_4] : memref<1x64xf32, #tpu.memory_space<vmem>>, vector<1x64xf32>
    %4 = vector.broadcast %3 : vector<1x64xf32> to vector<8x64xf32>
    %5 = arith.addf %2, %4 : vector<8x64xf32>
    %cst_5 = arith.constant 0.000000e+00 : f32
    %6 = vector.broadcast %cst_5 : f32 to vector<8x64xf32>
    %7 = arith.maximumf %5, %6 : vector<8x64xf32>
    %c0_6 = arith.constant 0 : index
    %c0_7 = arith.constant 0 : index
    %8 = vector.load %arg4[%c0_6, %c0_7] : memref<64x64xf32, #tpu.memory_space<vmem>>, vector<64x64xf32>
    %cst_8 = arith.constant dense<0.000000e+00> : vector<8x64xf32>
    %9 = tpu.matmul %7, %8, %cst_8 {dimension_numbers = #tpu.dot_dimension_numbers<[1], [0], [0], [1], [0, 0, 1, 1], [], []>} : vector<8x64xf32>, vector<64x64xf32>, vector<8x64xf32> -> vector<8x64xf32>
    %c0_9 = arith.constant 0 : index
    %c0_10 = arith.constant 0 : index
    %10 = vector.load %arg5[%c0_9, %c0_10] : memref<1x64xf32, #tpu.memory_space<vmem>>, vector<1x64xf32>
    %11 = vector.broadcast %10 : vector<1x64xf32> to vector<8x64xf32>
    %12 = arith.addf %9, %11 : vector<8x64xf32>
    %cst_11 = arith.constant 0.000000e+00 : f32
    %13 = vector.broadcast %cst_11 : f32 to vector<8x64xf32>
    %14 = arith.maximumf %12, %13 : vector<8x64xf32>
    %c0_12 = arith.constant 0 : index
    %c0_13 = arith.constant 0 : index
    %15 = vector.load %arg6[%c0_12, %c0_13] : memref<64x8xf32, #tpu.memory_space<vmem>>, vector<64x8xf32>
    %cst_14 = arith.constant dense<0.000000e+00> : vector<8x8xf32>
    %16 = tpu.matmul %14, %15, %cst_14 {dimension_numbers = #tpu.dot_dimension_numbers<[1], [0], [0], [1], [0, 0, 1, 1], [], []>} : vector<8x64xf32>, vector<64x8xf32>, vector<8x8xf32> -> vector<8x8xf32>
    %c0_15 = arith.constant 0 : index
    %c0_16 = arith.constant 0 : index
    %17 = vector.load %arg7[%c0_15, %c0_16] : memref<1x8xf32, #tpu.memory_space<vmem>>, vector<1x8xf32>
    %18 = vector.broadcast %17 : vector<1x8xf32> to vector<8x8xf32>
    %19 = arith.addf %16, %18 : vector<8x8xf32>
    %c0_17 = arith.constant 0 : index
    %c0_18 = arith.constant 0 : index
    %20 = vector.load %arg8[%c0_17, %c0_18] : memref<8x8xf32, #tpu.memory_space<vmem>>, vector<8x8xf32>
    tpu.vector_store %arg8[%c0_17, %c0_18], %19 {strides = array<i32>} : memref<8x8xf32, #tpu.memory_space<vmem>>, vector<8x8xf32>,
    return
  }
  func.func @transform_0(%arg0: i32) -> (i32, i32) {
    %c0_i32 = arith.constant 0 : i32
    %c0_i32_0 = arith.constant 0 : i32
    return %arg0, %c0_i32 : i32, i32
  }
  func.func @transform_1(%arg0: i32) -> (i32, i32) {
    %c0_i32 = arith.constant 0 : i32
    %c0_i32_0 = arith.constant 0 : i32
    %c0_i32_1 = arith.constant 0 : i32
    return %c0_i32, %c0_i32_0 : i32, i32
  }
  func.func @transform_2(%arg0: i32) -> (i32, i32) {
    %c0_i32 = arith.constant 0 : i32
    %c0_i32_0 = arith.constant 0 : i32
    %c0_i32_1 = arith.constant 0 : i32
    return %c0_i32, %c0_i32_0 : i32, i32
  }
  func.func @transform_3(%arg0: i32) -> (i32, i32) {
    %c0_i32 = arith.constant 0 : i32
    %c0_i32_0 = arith.constant 0 : i32
    %c0_i32_1 = arith.constant 0 : i32
    return %c0_i32, %c0_i32_0 : i32, i32
  }
  func.func @transform_4(%arg0: i32) -> (i32, i32) {
    %c0_i32 = arith.constant 0 : i32
    %c0_i32_0 = arith.constant 0 : i32
    %c0_i32_1 = arith.constant 0 : i32
    return %c0_i32, %c0_i32_0 : i32, i32
  }
  func.func @transform_5(%arg0: i32) -> (i32, i32) {
    %c0_i32 = arith.constant 0 : i32
    %c0_i32_0 = arith.constant 0 : i32
    %c0_i32_1 = arith.constant 0 : i32
    return %c0_i32, %c0_i32_0 : i32, i32
  }
  func.func @transform_6(%arg0: i32) -> (i32, i32) {
    %c0_i32 = arith.constant 0 : i32
    %c0_i32_0 = arith.constant 0 : i32
    %c0_i32_1 = arith.constant 0 : i32
    return %c0_i32, %c0_i32_0 : i32, i32
  }
  func.func @transform_7(%arg0: i32) -> (i32, i32) {
    %c0_i32 = arith.constant 0 : i32
    %c0_i32_0 = arith.constant 0 : i32
    return %arg0, %c0_i32 : i32, i32
  }
}

</mosaic_0001>

<bundles_post_ra>
// kernel: meta_controller_forward.1
= control target key start
LH: loop header
LB: loop body
LE: loop exit
PB: predicated region body
PF: predicated region fallthrough
CT: control target
= control target key end

     0   :  { %12 = vsyncpa [#allocation3], 0  ;;  %s346_s0 = inlined_call_operand.vmem [shape: f32[2,32], index: 0, kind: input, shape index: {}]   ;;  %s347_s1 = inlined_call_operand.hbm [shape: f32[32,64], index: 1, kind: input, shape index: {}]   ;;  %s348_s2 = inlined_call_operand.vmem [shape: f32[1,64], index: 2, kind: input, shape index: {}]   ;;  %s349_s3 = inlined_call_operand.vmem [shape: f32[64,64], index: 3, kind: input, shape index: {}]   ;;  %s350_s4 = inlined_call_operand.vmem [shape: f32[1,64], index: 4, kind: input, shape index: {}]   ;;  %s351_s5 = inlined_call_operand.vmem [shape: f32[64,8], index: 5, kind: input, shape index: {}]   ;;  %s352_s6 = inlined_call_operand.vmem [shape: f32[1,8], index: 6, kind: input, shape index: {}]   ;;  %s353_s7 = inlined_call_operand.hbm [shape: f32[2,8], index: 7, kind: output, shape index: {}]  }
   0x1   :  { %13 = vsyncpa [#allocation4], 0  ;;  %s20_s26 = sshll.u32 %s347_s1, 4  ;;  %s234_s27 = smov [#allocation2]   ;;  %s21_s26 = int_to_ptr.hbm [resolvable:$true] %s20_s26 }
   0x2   :  { %s22_s28 = sshll.u32 %s234_s27, 4  ;;  %s235_s29 = smov 128   ;;  %s23_s28 = int_to_ptr.vmem [resolvable:$true] %s22_s28 }
   0x3   :  { %s236_s30 = smov 8  }
   0x4   :  { %28 = dma.hbm_to_vmem [thread:$0]  %s21_s26, 512, %s23_s28, [#allocation3], %s235_s29, %s235_s29, %s236_s30  }
   0x5   :  { %230 = dma.done.wait [#allocation3], 512  }
   0x6   :  { %231 = vsyncadd [#allocation3], 4294966784  ;;  %v47_v0 = vld [vmem:[#allocation2 + $0x18] sm:$0xff]  ;;  %v46_v1 = vld [vmem:[#allocation2 + $0x10] sm:$0xff]  ;;  %vm52_vm0 = vcmask 261120   ;;  %vm89_vm1 = vcmask 523264  }
   0x7   :  { %68 = vmatpush.msra.mxu0 %v47_v0  ;;  %v84_v2 = vld [vmem:[%s349_s3 + $0x38] sm:$0xff]  ;;  %v45_v3 = vld [vmem:[#allocation2 + $0x8] sm:$0xff]  ;;  %v83_v4 = vld [vmem:[%s349_s3 + $0x30] sm:$0xff]  ;;  %vm149_vm2 = vcmask 64512  }
   0x8   :  { %101 = vmatpush.msra.mxu1 %v84_v2  ;;  %v82_v5 = vld [vmem:[%s349_s3 + $0x28] sm:$0xff]  ;;  %v44_v6 = vld [vmem:[#allocation2] sm:$0xff]  ;;  %v80_v9 = vld [vmem:[%s349_s3 + $0x18] sm:$0xff] }
   0x9   :  { %69 = vmatpush.msra.mxu0 %v46_v1  ;;  %v43_v7 = vld [vmem:[%s346_s0] sm:$0xff]  ;;  %v79_v10 = vld [vmem:[%s349_s3 + $0x10] sm:$0xff]  ;;  %v78_v11 = vld [vmem:[%s349_s3 + $0x8] sm:$0xff] }
   0xa   :  { %102 = vmatpush.msra.mxu1 %v83_v4  ;;  %v81_v8 = vld [vmem:[%s349_s3 + $0x20] sm:$0xff]  ;;  %v121_v13 = vld [vmem:[%s351_s5 + $0x38] sm:$0xff]  ;;  %v120_v14 = vld [vmem:[%s351_s5 + $0x30] sm:$0xff] }
   0xb   :  { %70 = vmatpush.msra.mxu0 %v45_v3  ;;  %v77_v12 = vld [vmem:[%s349_s3] sm:$0xff]  ;;  %137 = vmatpush.msra.mxu2 %v121_v13  ;;  %v119_v15 = vld [vmem:[%s351_s5 + $0x28] sm:$0xff]  ;;  %v117_v17 = vld [vmem:[%s351_s5 + $0x18] sm:$0xff] }
   0xc   :  { %103 = vmatpush.msra.mxu1 %v82_v5  ;;  %v118_v16 = vld [vmem:[%s351_s5 + $0x20] sm:$0xff]  ;;  %v116_v22 = vld [vmem:[%s351_s5 + $0x10] sm:$0xff]  ;;  %v115_v23 = vld [vmem:[%s351_s5 + $0x8] sm:$0xff] }
   0xd   :  { %71 = vmatpush.msra.mxu0 %v44_v6  ;;  %138 = vmatpush.msra.mxu2 %v120_v14  ;;  %v179_v18 = vld [vmem:[%s348_s2] ss:$0 sm:$0xff] }
   0xe   :  { %170 = vmatmul.msk.f32.vlgmr.msra.gmra.mxu0 %vm52_vm0, %v43_v7  ;;  %104 = vmatpush.msra.mxu1 %v81_v8  ;;  %v114_v24 = vld [vmem:[%s351_s5] sm:$0xff] }
   0xf   :  { %139 = vmatpush.msra.mxu2 %v119_v15  ;;  %v180_v25 = vld [vmem:[%s350_s4] ss:$0 sm:$0xff] }
  0x10   :  { %105 = vmatpush.msra.mxu1 %v80_v9  ;;  %v181_v29 = vld [vmem:[%s352_s6] ss:$0 sm:$0xff] }
  0x11   :  { %140 = vmatpush.msra.mxu2 %v118_v16 }
  0x12   :  { %106 = vmatpush.msra.mxu1 %v79_v10 }
  0x13   :  { %141 = vmatpush.msra.mxu2 %v117_v17 }
  0x14   :  { %107 = vmatpush.msra.mxu1 %v78_v11 }
  0x15   :  { %142 = vmatpush.msra.mxu2 %v116_v22 }
  0x16   :  { %108 = vmatpush.msra.mxu1 %v77_v12 }
  0x17   :  { %143 = vmatpush.msra.mxu2 %v115_v23 }
  0x19   :  { %144 = vmatpush.msra.mxu2 %v114_v24 }
  0x8b   :  { %v73_v19 = vpop.f32.mrf.mxu0 }
  0x8c   :  { %v74_v20 = vadd.f32 %v179_v18, %v73_v19 }
  0x8e   :  { %v76_v21 = vmax.f32 %v74_v20, 0.0 }
  0x90   :  { %171 = vmatmul.msk.f32.vlgmr.msra.gmra.mxu1 %vm89_vm1, %v76_v21 }
 0x10d   :  { %v110_v26 = vpop.f32.mrf.mxu1 }
 0x10e   :  { %v111_v27 = vadd.f32 %v180_v25, %v110_v26 }
 0x110   :  { %v113_v28 = vmax.f32 %v111_v27, 0.0 }
 0x112   :  { %172 = vmatmul.msk.f32.vlgmr.msra.gmra.mxu2 %vm89_vm1, %v113_v28 }
 0x195   :  { %v146_v30 = vpop.f32.mrf.mxu2 }
 0x196   :  { %v147_v31 = vadd.f32 %v181_v29, %v146_v30 }
 0x198   :  { %150 = vst.msk [vmem:[#allocation5] sm:$0xff] %vm149_vm2, %v147_v31 }
 0x199   :  { %154 = vsyncadd [#allocation4], 96  ;;  %s157_s0 = sshll.u32 %s353_s7, 4  ;;  %s237_s21 = smov [#allocation5]   ;;  %s158_s0 = int_to_ptr.hbm [resolvable:$true] %s157_s0 }
 0x19a   :  { %s155_s22 = sshll.u32 %s237_s21, 4  ;;  %s238_s4 = smov 32   ;;  %s156_s22 = int_to_ptr.vmem [resolvable:$true] %s155_s22 }
 0x19b   :  { %s239_s23 = smov 2  }
 0x19c   :  { %163 = dma.vmem_to_hbm [thread:$0]  %s156_s22, 32, %s158_s0, [#allocation4], %s238_s4, %s238_s4, %s239_s23  }
 0x19d   :  { %232 = dma.done.wait [#allocation4], 128  }
 0x19e   :  { %233 = vsyncadd [#allocation4], 4294967168 }
 0x19f   :  { %168 = vsyncpa [#allocation3], 1 }
 0x1a0   :  { %169 = vsyncpa [#allocation4], 1 }

</bundles_post_ra>
